<compile_context>
chip_gen: v7x
topology: tpu7x:2x2x1
jax: 0.10.0
libtpu: 0.0.40
codegen_flags: <defaults>
</compile_context>

<pallas_src>
import functools

import jax
import jax.numpy as jnp
from jax.experimental import pallas as pl
from jax.experimental.pallas import tpu as pltpu


def _ddi_gcn_kernel(inter_ref, a_tl_ref, a_tr_ref, a_bl_ref, a_br_ref, e_ref,
                    o_ref, acc1_ref, acc2_ref):
    k = pl.program_id(2)

    @pl.when(k == 0)
    def _():
        acc1_ref[...] = jnp.zeros_like(acc1_ref)
        acc2_ref[...] = jnp.zeros_like(acc2_ref)

    e = e_ref[...]
    # adj1 @ [m; m] == (adj1[:, :N] + adj1[:, N:]) @ m  -> half the MXU FLOPs.
    acc1_ref[...] += jnp.dot(a_tl_ref[...] + a_tr_ref[...], e,
                             preferred_element_type=jnp.float32)
    acc2_ref[...] += jnp.dot(a_bl_ref[...] + a_br_ref[...], e,
                             preferred_element_type=jnp.float32)

    @pl.when(k == pl.num_programs(2) - 1)
    def _():
        # LeakyReLU(0.5) followed by ReLU is exactly ReLU; the sum of the two
        # identical GCN layers (2 * tem1) folds into the blend scalars.
        s1 = 2.0 * inter_ref[0]
        s2 = 2.0 - s1
        y1 = jnp.maximum(acc1_ref[...], 0.0)   # rows [:N]  of gnnEmbeds1 (/2)
        y2 = jnp.maximum(acc2_ref[...], 0.0)   # rows [N:]  of gnnEmbeds1 (/2)
        o_ref[...] = (s1 * y1 + s2 * y2).astype(o_ref.dtype)


@functools.partial(jax.jit, static_argnames=("tm", "tn", "tk"))
def ddi_gcn_forward(adj1, m_embed, inter, *, tm=256, tn=512, tk=512):
    """Pallas implementation of DDI_gcn.forward.

    adj1    : (2N, 2N) float32
    m_embed : (N, F)   float32
    inter   : (1,)     float32
    returns : (N, F)   float32
    """
    n, f = m_embed.shape
    two_n = 2 * n
    assert adj1.shape == (two_n, two_n)

    # Clamp default tiles to the problem size (demo collapses to one grid step).
    tm = min(tm, n)
    tn = min(tn, f)
    tk = min(tk, n)
    assert n % tm == 0 and f % tn == 0 and n % tk == 0
    # TODO(synk): arbitrary N/F would need zero-padding to tile multiples.

    mb = n // tm   # block-row offset of adj1's bottom half
    kb = n // tk   # block-col offset of adj1's right half
    grid = (n // tm, f // tn, n // tk)

    cost = pl.CostEstimate(
        flops=4 * n * n * f,                               # 2 folded matmuls
        transcendentals=0,
        bytes_accessed=4 * (two_n * two_n + 2 * n * f),    # adj + embed + out (f32)
    )

    return pl.pallas_call(
        _ddi_gcn_kernel,
        out_shape=jax.ShapeDtypeStruct((n, f), jnp.float32),
        grid_spec=pltpu.PrefetchScalarGridSpec(
            num_scalar_prefetch=1,                 # `inter` lives in SMEM
            grid=grid,
            in_specs=[
                # Four quadrant views of the SAME adj1 operand (no pre-slicing).
                pl.BlockSpec((tm, tk), lambda i, j, k, it: (i, k)),            # top-left
                pl.BlockSpec((tm, tk), lambda i, j, k, it: (i, k + kb)),       # top-right
                pl.BlockSpec((tm, tk), lambda i, j, k, it: (i + mb, k)),       # bot-left
                pl.BlockSpec((tm, tk), lambda i, j, k, it: (i + mb, k + kb)),  # bot-right
                pl.BlockSpec((tk, tn), lambda i, j, k, it: (k, j)),            # m_embed
            ],
            out_specs=pl.BlockSpec((tm, tn), lambda i, j, k, it: (i, j)),
            scratch_shapes=[
                pltpu.VMEM((tm, tn), jnp.float32),
                pltpu.VMEM((tm, tn), jnp.float32),
            ],
        ),
        compiler_params=pltpu.CompilerParams(
            dimension_semantics=("parallel", "parallel", "arbitrary")),
        cost_estimate=cost,
    )(inter, adj1, adj1, adj1, adj1, m_embed)


def ddi_gcn_reference(adj1, m_embed, inter):
    """Plain-JAX reference mirroring the PyTorch forward exactly."""
    embeds1 = jnp.concatenate([m_embed, m_embed], axis=0)
    n = m_embed.shape[0]
    gnn_lats = []
    lats = [embeds1]
    for _ in range(2):
        y = adj1 @ lats[-1]
        y = jnp.where(y >= 0, y, 0.5 * y)      # LeakyReLU(0.5)
        y = jnp.maximum(y, 0.0)                # ReLU
        gnn_lats.append(y)
    gnn_embeds = sum(gnn_lats)
    m1 = gnn_embeds[:n]
    m2 = gnn_embeds[n:]
    return inter[0] * m1 + (1.0 - inter[0]) * m2


def xavier_uniform(key, shape, dtype=jnp.float32):
    fan_in, fan_out = shape[0], shape[1]
    bound = (6.0 / (fan_in + fan_out)) ** 0.5
    return jax.random.uniform(key, shape, dtype, minval=-bound, maxval=bound)


if __name__ == "__main__":
    mednum = 128      # N
    featuredim = 128  # F

    key = jax.random.PRNGKey(0)
    k_embed, k_adj = jax.random.split(key)

    # Deterministic parameter init (synthetic, no checkpoint load).
    m_embed = xavier_uniform(k_embed, (mednum, featuredim))
    inter = jnp.array([0.3], dtype=jnp.float32)   # nn.Parameter(FloatTensor(1))

    # Synthetic (dense) adjacency over 2N drug nodes.
    adj1 = jax.random.uniform(k_adj, (2 * mednum, 2 * mednum), jnp.float32)

    out = ddi_gcn_forward(adj1, m_embed, inter)
    out = jax.block_until_ready(out)

    ref = ddi_gcn_reference(adj1, m_embed, inter)
    assert out.shape == (mednum, featuredim)
    assert jnp.allclose(out, ref, atol=1e-4, rtol=1e-4)

    print("KERNEL_OK")
</pallas_src>

<mosaic_0001>
module attributes {stable_mosaic.version = 11 : i64} {
  func.func @_ddi_gcn_kernel(%arg0: i32, %arg1: i32, %arg2: i32, %arg3: memref<1xf32, #tpu.memory_space<smem>>, %arg4: memref<128x128xf32, #tpu.memory_space<vmem>>, %arg5: memref<128x128xf32, #tpu.memory_space<vmem>>, %arg6: memref<128x128xf32, #tpu.memory_space<vmem>>, %arg7: memref<128x128xf32, #tpu.memory_space<vmem>>, %arg8: memref<128x128xf32, #tpu.memory_space<vmem>>, %arg9: memref<128x128xf32, #tpu.memory_space<vmem>>, %arg10: memref<128x128xf32, #tpu.memory_space<vmem>>, %arg11: memref<128x128xf32, #tpu.memory_space<vmem>>) attributes {dimension_semantics = [#tpu.dimension_semantics<parallel>, #tpu.dimension_semantics<parallel>, #tpu.dimension_semantics<arbitrary>], iteration_bounds = array<i64: 1, 1, 1>, scalar_prefetch = 1 : i64, scratch_operands = 2 : i64, tpu.core_type = #tpu.core_type<tc>, window_params = [{transform_indices = @transform_0, window_bounds = array<i64: 128, 128>}, {transform_indices = @transform_1, window_bounds = array<i64: 128, 128>}, {transform_indices = @transform_2, window_bounds = array<i64: 128, 128>}, {transform_indices = @transform_3, window_bounds = array<i64: 128, 128>}, {transform_indices = @transform_4, window_bounds = array<i64: 128, 128>}, {transform_indices = @transform_5, window_bounds = array<i64: 128, 128>}]} {
    %c0_i32 = arith.constant 0 : i32
    %0 = arith.cmpi eq, %arg2, %c0_i32 : i32
    %1 = arith.extui %0 : i1 to i32
    %c0_i32_0 = arith.constant 0 : i32
    %2 = arith.cmpi ne, %1, %c0_i32_0 : i32
    scf.if %2 {
      %cst_21 = arith.constant 0.000000e+00 : f32
      %21 = vector.broadcast %cst_21 : f32 to vector<128x128xf32>
      %c0_22 = arith.constant 0 : index
      %c0_23 = arith.constant 0 : index
      %22 = vector.load %arg10[%c0_22, %c0_23] : memref<128x128xf32, #tpu.memory_space<vmem>>, vector<128x128xf32>
      tpu.vector_store %arg10[%c0_22, %c0_23], %21 {strides = array<i32>} : memref<128x128xf32, #tpu.memory_space<vmem>>, vector<128x128xf32>,
      %cst_24 = arith.constant 0.000000e+00 : f32
      %23 = vector.broadcast %cst_24 : f32 to vector<128x128xf32>
      %c0_25 = arith.constant 0 : index
      %c0_26 = arith.constant 0 : index
      %24 = vector.load %arg11[%c0_25, %c0_26] : memref<128x128xf32, #tpu.memory_space<vmem>>, vector<128x128xf32>
      tpu.vector_store %arg11[%c0_25, %c0_26], %23 {strides = array<i32>} : memref<128x128xf32, #tpu.memory_space<vmem>>, vector<128x128xf32>,
    } else {
    }
    %c0 = arith.constant 0 : index
    %c0_1 = arith.constant 0 : index
    %3 = vector.load %arg8[%c0, %c0_1] : memref<128x128xf32, #tpu.memory_space<vmem>>, vector<128x128xf32>
    %c0_2 = arith.constant 0 : index
    %c0_3 = arith.constant 0 : index
    %4 = vector.load %arg10[%c0_2, %c0_3] : memref<128x128xf32, #tpu.memory_space<vmem>>, vector<128x128xf32>
    %c0_4 = arith.constant 0 : index
    %c0_5 = arith.constant 0 : index
    %5 = vector.load %arg4[%c0_4, %c0_5] : memref<128x128xf32, #tpu.memory_space<vmem>>, vector<128x128xf32>
    %c0_6 = arith.constant 0 : index
    %c0_7 = arith.constant 0 : index
    %6 = vector.load %arg5[%c0_6, %c0_7] : memref<128x128xf32, #tpu.memory_space<vmem>>, vector<128x128xf32>
    %7 = arith.addf %5, %6 : vector<128x128xf32>
    %cst = arith.constant dense<0.000000e+00> : vector<128x128xf32>
    %8 = tpu.matmul %7, %3, %cst {dimension_numbers = #tpu.dot_dimension_numbers<[1], [0], [0], [1], [0, 0, 1, 1], [], []>} : vector<128x128xf32>, vector<128x128xf32>, vector<128x128xf32> -> vector<128x128xf32>
    %9 = arith.addf %4, %8 : vector<128x128xf32>
    %c0_8 = arith.constant 0 : index
    %c0_9 = arith.constant 0 : index
    %10 = vector.load %arg10[%c0_8, %c0_9] : memref<128x128xf32, #tpu.memory_space<vmem>>, vector<128x128xf32>
    tpu.vector_store %arg10[%c0_8, %c0_9], %9 {strides = array<i32>} : memref<128x128xf32, #tpu.memory_space<vmem>>, vector<128x128xf32>,
    %c0_10 = arith.constant 0 : index
    %c0_11 = arith.constant 0 : index
    %11 = vector.load %arg11[%c0_10, %c0_11] : memref<128x128xf32, #tpu.memory_space<vmem>>, vector<128x128xf32>
    %c0_12 = arith.constant 0 : index
    %c0_13 = arith.constant 0 : index
    %12 = vector.load %arg6[%c0_12, %c0_13] : memref<128x128xf32, #tpu.memory_space<vmem>>, vector<128x128xf32>
    %c0_14 = arith.constant 0 : index
    %c0_15 = arith.constant 0 : index
    %13 = vector.load %arg7[%c0_14, %c0_15] : memref<128x128xf32, #tpu.memory_space<vmem>>, vector<128x128xf32>
    %14 = arith.addf %12, %13 : vector<128x128xf32>
    %cst_16 = arith.constant dense<0.000000e+00> : vector<128x128xf32>
    %15 = tpu.matmul %14, %3, %cst_16 {dimension_numbers = #tpu.dot_dimension_numbers<[1], [0], [0], [1], [0, 0, 1, 1], [], []>} : vector<128x128xf32>, vector<128x128xf32>, vector<128x128xf32> -> vector<128x128xf32>
    %16 = arith.addf %11, %15 : vector<128x128xf32>
    %c0_17 = arith.constant 0 : index
    %c0_18 = arith.constant 0 : index
    %17 = vector.load %arg11[%c0_17, %c0_18] : memref<128x128xf32, #tpu.memory_space<vmem>>, vector<128x128xf32>
    tpu.vector_store %arg11[%c0_17, %c0_18], %16 {strides = array<i32>} : memref<128x128xf32, #tpu.memory_space<vmem>>, vector<128x128xf32>,
    %c0_i32_19 = arith.constant 0 : i32
    %18 = arith.cmpi eq, %arg2, %c0_i32_19 : i32
    %19 = arith.extui %18 : i1 to i32
    %c0_i32_20 = arith.constant 0 : i32
    %20 = arith.cmpi ne, %19, %c0_i32_20 : i32
    scf.if %20 {
      %c0_21 = arith.constant 0 : index
      %21 = memref.load %arg3[%c0_21] : memref<1xf32, #tpu.memory_space<smem>>
      %cst_22 = arith.constant 2.000000e+00 : f32
      %22 = arith.mulf %cst_22, %21 : f32
      %cst_23 = arith.constant 2.000000e+00 : f32
      %23 = arith.subf %cst_23, %22 : f32
      %c0_24 = arith.constant 0 : index
      %c0_25 = arith.constant 0 : index
      %24 = vector.load %arg10[%c0_24, %c0_25] : memref<128x128xf32, #tpu.memory_space<vmem>>, vector<128x128xf32>
      %cst_26 = arith.constant 0.000000e+00 : f32
      %25 = vector.broadcast %cst_26 : f32 to vector<128x128xf32>
      %26 = arith.maximumf %24, %25 : vector<128x128xf32>
      %c0_27 = arith.constant 0 : index
      %c0_28 = arith.constant 0 : index
      %27 = vector.load %arg11[%c0_27, %c0_28] : memref<128x128xf32, #tpu.memory_space<vmem>>, vector<128x128xf32>
      %cst_29 = arith.constant 0.000000e+00 : f32
      %28 = vector.broadcast %cst_29 : f32 to vector<128x128xf32>
      %29 = arith.maximumf %27, %28 : vector<128x128xf32>
      %30 = vector.broadcast %22 : f32 to vector<128x128xf32>
      %31 = arith.mulf %30, %26 : vector<128x128xf32>
      %32 = vector.broadcast %23 : f32 to vector<128x128xf32>
      %33 = arith.mulf %32, %29 : vector<128x128xf32>
      %34 = arith.addf %31, %33 : vector<128x128xf32>
      %c0_30 = arith.constant 0 : index
      %c0_31 = arith.constant 0 : index
      %35 = vector.load %arg9[%c0_30, %c0_31] : memref<128x128xf32, #tpu.memory_space<vmem>>, vector<128x128xf32>
      tpu.vector_store %arg9[%c0_30, %c0_31], %34 {strides = array<i32>} : memref<128x128xf32, #tpu.memory_space<vmem>>, vector<128x128xf32>,
    } else {
    }
    return
  }
  func.func @transform_0(%arg0: i32, %arg1: i32, %arg2: i32, %arg3: memref<1xf32, #tpu.memory_space<smem>>) -> (i32, i32) {
    %c0_i32 = arith.constant 0 : i32
    return %arg0, %arg2 : i32, i32
  }
  func.func @transform_1(%arg0: i32, %arg1: i32, %arg2: i32, %arg3: memref<1xf32, #tpu.memory_space<smem>>) -> (i32, i32) {
    %c1_i32 = arith.constant 1 : i32
    %0 = arith.addi %arg2, %c1_i32 : i32
    %c0_i32 = arith.constant 0 : i32
    return %arg0, %0 : i32, i32
  }
  func.func @transform_2(%arg0: i32, %arg1: i32, %arg2: i32, %arg3: memref<1xf32, #tpu.memory_space<smem>>) -> (i32, i32) {
    %c1_i32 = arith.constant 1 : i32
    %0 = arith.addi %arg0, %c1_i32 : i32
    %c0_i32 = arith.constant 0 : i32
    return %0, %arg2 : i32, i32
  }
  func.func @transform_3(%arg0: i32, %arg1: i32, %arg2: i32, %arg3: memref<1xf32, #tpu.memory_space<smem>>) -> (i32, i32) {
    %c1_i32 = arith.constant 1 : i32
    %0 = arith.addi %arg0, %c1_i32 : i32
    %c1_i32_0 = arith.constant 1 : i32
    %1 = arith.addi %arg2, %c1_i32_0 : i32
    %c0_i32 = arith.constant 0 : i32
    return %0, %1 : i32, i32
  }
  func.func @transform_4(%arg0: i32, %arg1: i32, %arg2: i32, %arg3: memref<1xf32, #tpu.memory_space<smem>>) -> (i32, i32) {
    %c0_i32 = arith.constant 0 : i32
    return %arg2, %arg1 : i32, i32
  }
  func.func @transform_5(%arg0: i32, %arg1: i32, %arg2: i32, %arg3: memref<1xf32, #tpu.memory_space<smem>>) -> (i32, i32) {
    %c0_i32 = arith.constant 0 : i32
    return %arg0, %arg1 : i32, i32
  }
}

</mosaic_0001>

<bundles_post_ra>
// kernel: ddi_gcn_forward.1
= control target key start
LH: loop header
LB: loop body
LE: loop exit
PB: predicated region body
PF: predicated region fallthrough
CT: control target
= control target key end

     0   :  { %12 = vsyncpa [#allocation7], 0  ;;  %s1396_s0 = inlined_call_operand.<no memory space> [shape: f32[1], index: 0, kind: input, shape index: {}]   ;;  %s1397_s1 = inlined_call_operand.hbm [shape: f32[256,256], index: 1, kind: input, shape index: {}, may-alias: {1,2,3,4}]   ;;  %s1398_s2 = inlined_call_operand.hbm [shape: f32[256,256], index: 2, kind: input, shape index: {}, may-alias: {1,2,3,4}]   ;;  %s1399_s3 = inlined_call_operand.hbm [shape: f32[256,256], index: 3, kind: input, shape index: {}, may-alias: {1,2,3,4}]   ;;  %s1400_s4 = inlined_call_operand.hbm [shape: f32[256,256], index: 4, kind: input, shape index: {}, may-alias: {1,2,3,4}]   ;;  %s1401_s5 = inlined_call_operand.hbm [shape: f32[128,128], index: 5, kind: input, shape index: {}]   ;;  %s1402_s6 = inlined_call_operand.hbm [shape: f32[128,128], index: 6, kind: output, shape index: {}]  }
   0x1   :  { %13 = vsyncpa [#allocation10], 0 }
   0x2   :  { %14 = vsyncpa [#allocation13], 0 }
   0x3   :  { %15 = vsyncpa [#allocation8], 0  ;;  %s1249_s23 = scalar_lea.hbm %s1398_s2, 128  ;;  %s1254_s26 = scalar_lea.hbm %s1400_s4, 4224 }
   0x4   :  { %s1202_s27 = smov [#allocation9]   ;;  %s1203_s29 = smov [#allocation12]  }
   0x5   :  { %s36_s28 = sshll.u32 %s1202_s27, 4  ;;  %s72_s30 = sshll.u32 %s1203_s29, 4  ;;  %s37_s28 = int_to_ptr.vmem [resolvable:$true] %s36_s28  ;;  %s73_s30 = int_to_ptr.vmem [resolvable:$true] %s72_s30 }
   0x6   :  { %s1077_s9 = scalar_lea.hbm %s1398_s2, 2176  ;;  %s1055_s12 = scalar_lea.hbm %s1398_s2, 8192 }
   0x7   :  { %p1054_p0 = scmp.ne.s32.totalorder %s1249_s23, %s1077_s9  ;;  %p1056_p1 = scmp.lt.u32.totalorder %s1249_s23, %s1398_s2 }
   0x8   :  { %p1057_p2 = scmp.lt.u32.totalorder %s1055_s12, %s1077_s9  ;;  %p1059_p4 = scmp.lt.u32.totalorder %s1077_s9, %s1249_s23 }
   0xa   :  { %p1058_p3 = por %p1057_p2, %p1056_p1 }
   0xc   :  { %p1060_p5 = por %p1059_p4, %p1058_p3 }
   0xe   :  { %p1061_p6 = pnand %p1060_p5, %p1054_p0 }
  0x10   :  { %1064 = shalt.err (!%p1061_p6)
}
  0x11   :  { %s1065_s15 = scalar_lea.vmem %s37_s28, 2048  ;;  %p1070_p8 = scmp.lt.s32.totalorder %s37_s28, %s37_s28 }
  0x12   :  { %p1066_p7 = scmp.ne.s32.totalorder %s37_s28, %s1065_s15  ;;  %p1071_p9 = scmp.lt.s32.totalorder %s1065_s15, %s1065_s15 }
  0x14   :  { %p1072_p10 = por %p1071_p9, %p1070_p8 }
  0x16   :  { %p1073_p11 = pnand %p1072_p10, %p1066_p7 }
  0x18   :  { %1076 = shalt.err (!%p1073_p11)
}
  0x19   :  { %s1204_s16 = smov 256   ;;  %s1205_s17 = smov 128  }
  0x1a   :  { %s1206_s2 = smov 8   ;;  %s1102_s20 = scalar_lea.hbm %s1400_s4, 6272 }
  0x1b   :  { %42 = dma.hbm_to_vmem [thread:$0]  %s1249_s23, 2048, %s37_s28, [#allocation10], %s1204_s16, %s1205_s17, %s1206_s2  }
  0x1c   :  { %p1079_p12 = scmp.ne.s32.totalorder %s1254_s26, %s1102_s20  ;;  %s1080_s24 = scalar_lea.hbm %s1400_s4, 8192 }
  0x1d   :  { %p1081_p13 = scmp.lt.u32.totalorder %s1254_s26, %s1400_s4  ;;  %p1082_p0 = scmp.lt.u32.totalorder %s1080_s24, %s1102_s20 }
  0x1e   :  { %p1084_p2 = scmp.lt.u32.totalorder %s1102_s20, %s1254_s26 }
  0x1f   :  { %p1083_p1 = por %p1082_p0, %p1081_p13 }
  0x21   :  { %p1085_p3 = por %p1084_p2, %p1083_p1 }
  0x23   :  { %p1086_p4 = pnand %p1085_p3, %p1079_p12 }
  0x25   :  { %1089 = shalt.err (!%p1086_p4)
}
  0x26   :  { %s1090_s23 = scalar_lea.vmem %s73_s30, 2048  ;;  %p1095_p6 = scmp.lt.s32.totalorder %s73_s30, %s73_s30 }
  0x27   :  { %p1091_p5 = scmp.ne.s32.totalorder %s73_s30, %s1090_s23  ;;  %p1096_p7 = scmp.lt.s32.totalorder %s1090_s23, %s1090_s23 }
  0x29   :  { %p1097_p8 = por %p1096_p7, %p1095_p6 }
  0x2b   :  { %p1098_p9 = pnand %p1097_p8, %p1091_p5 }
  0x2d   :  { %1101 = shalt.err (!%p1098_p9)
}
  0x2e   :  { %78 = dma.hbm_to_vmem [thread:$0]  %s1254_s26, 2048, %s73_s30, [#allocation13], %s1204_s16, %s1205_s17, %s1206_s2  }
  0x2f   :  { %s1207_s28 = smov [#allocation6]   ;;  %s1291_s8 = scalar_lea.hbm %s1399_s3, 4096 }
  0x30   :  { %s21_s4 = sshll.u32 %s1207_s28, 4  ;;  %s1103_s11 = scalar_lea.hbm %s1397_s1, 2048  ;;  %s22_s4 = int_to_ptr.vmem [resolvable:$true] %s21_s4 }
  0x31   :  { %p1104_p10 = scmp.ne.s32.totalorder %s1397_s1, %s1103_s11  ;;  %s1105_s26 = scalar_lea.hbm %s1397_s1, 8192 }
  0x32   :  { %p1106_p11 = scmp.lt.u32.totalorder %s1105_s26, %s1103_s11  ;;  %p1107_p12 = scmp.lt.u32.totalorder %s1103_s11, %s1397_s1 }
  0x34   :  { %p1108_p13 = por %p1107_p12, %p1106_p11 }
  0x36   :  { %p1109_p0 = pnand %p1108_p13, %p1104_p10 }
  0x38   :  { %1112 = shalt.err (!%p1109_p0)
}
  0x39   :  { %s1113_s19 = scalar_lea.vmem %s22_s4, 2048  ;;  %p1118_p2 = scmp.lt.s32.totalorder %s22_s4, %s22_s4 }
  0x3a   :  { %p1114_p1 = scmp.ne.s32.totalorder %s22_s4, %s1113_s19  ;;  %p1119_p3 = scmp.lt.s32.totalorder %s1113_s19, %s1113_s19 }
  0x3c   :  { %p1120_p4 = por %p1119_p3, %p1118_p2 }
  0x3e   :  { %p1121_p5 = pnand %p1120_p4, %p1114_p1 }
  0x40   :  { %1124 = shalt.err (!%p1121_p5)
}
  0x41   :  { %27 = dma.hbm_to_vmem [thread:$0]  %s1397_s1, 2048, %s22_s4, [#allocation7], %s1204_s16, %s1205_s17, %s1206_s2  }
  0x42   :  { %s1208_s22 = smov [#allocation11]   ;;  %s1209_s25 = smov [#allocation14]  }
  0x43   :  { %s53_s24 = sshll.u32 %s1208_s22, 4  ;;  %s84_s27 = sshll.u32 %s1209_s25, 4  ;;  %s54_s24 = int_to_ptr.vmem [resolvable:$true] %s53_s24  ;;  %s85_s27 = int_to_ptr.vmem [resolvable:$true] %s84_s27 }
  0x44   :  { %s1149_s29 = scalar_lea.hbm %s1399_s3, 6144  ;;  %s1127_s10 = scalar_lea.hbm %s1399_s3, 8192 }
  0x45   :  { %p1126_p6 = scmp.ne.s32.totalorder %s1291_s8, %s1149_s29  ;;  %p1128_p7 = scmp.lt.u32.totalorder %s1291_s8, %s1399_s3 }
  0x46   :  { %p1129_p8 = scmp.lt.u32.totalorder %s1127_s10, %s1149_s29  ;;  %p1131_p10 = scmp.lt.u32.totalorder %s1149_s29, %s1291_s8 }
  0x48   :  { %p1130_p9 = por %p1129_p8, %p1128_p7 }
  0x4a   :  { %p1132_p11 = por %p1131_p10, %p1130_p9 }
  0x4c   :  { %p1133_p12 = pnand %p1132_p11, %p1126_p6 }
  0x4e   :  { %1136 = shalt.err (!%p1133_p12)
}
  0x4f   :  { %s1137_s1 = scalar_lea.vmem %s54_s24, 2048  ;;  %p1142_p0 = scmp.lt.s32.totalorder %s54_s24, %s54_s24 }
  0x50   :  { %p1138_p13 = scmp.ne.s32.totalorder %s54_s24, %s1137_s1  ;;  %p1143_p1 = scmp.lt.s32.totalorder %s1137_s1, %s1137_s1 }
  0x52   :  { %p1144_p2 = por %p1143_p1, %p1142_p0 }
  0x54   :  { %p1145_p3 = pnand %p1144_p2, %p1138_p13 }
  0x56   :  { %1148 = shalt.err (!%p1145_p3)
}
  0x57   :  { %59 = dma.hbm_to_vmem [thread:$0]  %s1291_s8, 2048, %s54_s24, [#allocation10], %s1204_s16, %s1205_s17, %s1206_s2  }
  0x58   :  { %s1150_s13 = scalar_lea.hbm %s1401_s5, 2048 }
  0x59   :  { %p1151_p4 = scmp.ne.s32.totalorder %s1401_s5, %s1150_s13  ;;  %p1154_p5 = scmp.lt.u32.totalorder %s1150_s13, %s1401_s5 }
  0x5b   :  { %p1156_p6 = pnand %p1154_p5, %p1151_p4 }
  0x5d   :  { %1159 = shalt.err (!%p1156_p6)
}
  0x5e   :  { %s1160_s18 = scalar_lea.vmem %s85_s27, 2048  ;;  %p1165_p8 = scmp.lt.s32.totalorder %s85_s27, %s85_s27 }
  0x5f   :  { %p1161_p7 = scmp.ne.s32.totalorder %s85_s27, %s1160_s18  ;;  %p1166_p9 = scmp.lt.s32.totalorder %s1160_s18, %s1160_s18 }
  0x61   :  { %p1167_p10 = por %p1166_p9, %p1165_p8 }
  0x63   :  { %p1168_p11 = pnand %p1167_p10, %p1161_p7 }
  0x65   :  { %1171 = shalt.err (!%p1168_p11)
}
  0x66   :  { %90 = dma.hbm_to_vmem [thread:$0]  %s1401_s5, 2048, %s85_s27, [#allocation13], %s1205_s17, %s1205_s17, %s1206_s2  }
  0x67   :  { %1194 = dma.done.wait [#allocation7], 2048  }
  0x68   :  { %1195 = vsyncadd [#allocation7], 4294965248 }
  0x69   :  { %1196 = dma.done.wait [#allocation10], 4096  }
  0x6a   :  { %1197 = vsyncadd [#allocation10], 4294963200 }
  0x6b   :  { %1198 = dma.done.wait [#allocation13], 4096  }
  0x6c   :  { %1199 = vsyncadd [#allocation13], 4294963200  ;;  %v148_v0 = vld [vmem:[#allocation14] sm:$0xff]  ;;  %v149_v1 = vld [vmem:[#allocation14 + $0x8] sm:$0xff]  ;;  %s650_s20 = smul.f32 2.0, %s1396_s0  ;;  %s1210_s0 = smov [#allocation15]  }
  0x6d   :  { %v150_v2 = vld [vmem:[#allocation14 + $0x10] sm:$0xff]  ;;  %v980_v3 = vpack.c.bf16 %v149_v1, %v148_v0  ;;  %v151_v4 = vld [vmem:[#allocation14 + $0x18] sm:$0xff]  ;;  %v152_v6 = vld [vmem:[#allocation14 + $0x20] sm:$0xff]  ;;  %s787_s22 = sshll.u32 %s1210_s0, 4  ;;  %s788_s22 = int_to_ptr.vmem [resolvable:$true] %s787_s22 }
  0x6e   :  { %v984_v5 = vpack.c.bf16 %v151_v4, %v150_v2  ;;  %v153_v7 = vld [vmem:[#allocation14 + $0x28] sm:$0xff]  ;;  %v154_v9 = vld [vmem:[#allocation14 + $0x30] sm:$0xff]  ;;  %v180_v10 = vld [vmem:[#allocation6] sm:$0xff]  ;;  %s651_s21 = ssub.f32 2.0, %s650_s20  ;;  %s1172_s24 = scalar_lea.vmem %s788_s22, 2048 }
  0x6f   :  { %981 = vmatprep.subr.bf16.mxu0 %v980_v3  ;;  %1013 = vmatprep.subr.bf16.mxu1 %v980_v3  ;;  %v988_v8 = vpack.c.bf16 %v153_v7, %v152_v6  ;;  %v196_v11 = vld [vmem:[#allocation9] sm:$0xff]  ;;  %v155_v12 = vld [vmem:[#allocation14 + $0x38] sm:$0xff]  ;;  %v157_v19 = vld [vmem:[#allocation14 + $0x48] sm:$0xff]  ;;  %p1173_p12 = scmp.ne.s32.totalorder %s788_s22, %s1172_s24  ;;  %p1177_p13 = scmp.lt.s32.totalorder %s788_s22, %s788_s22 }
  0x70   :  { %983 = vmatpush3.bf16.msra.mxu0 %v980_v3  ;;  %1015 = vmatpush3.bf16.msra.mxu1 %v980_v3  ;;  %v212_v13 = vadd.f32 %v196_v11, %v180_v10  ;;  %v421_v14 = vld [vmem:[#allocation11] sm:$0xff]  ;;  %v992_v17 = vpack.c.bf16 %v155_v12, %v154_v9  ;;  %v158_v21 = vld [vmem:[#allocation14 + $0x50] sm:$0xff]  ;;  %v159_v22 = vld [vmem:[#allocation14 + $0x58] sm:$0xff]  ;;  %p1178_p0 = scmp.lt.s32.totalorder %s1172_s24, %s1172_s24 }
  0x71   :  { %985 = vmatprep.subr.bf16.mxu0 %v984_v5  ;;  %1017 = vmatprep.subr.bf16.mxu1 %v984_v5  ;;  %v437_v15 = vld [vmem:[#allocation12] sm:$0xff]  ;;  %v1000_v23 = vpack.c.bf16 %v159_v22, %v158_v21  ;;  %v161_v25 = vld [vmem:[#allocation14 + $0x68] sm:$0xff]  ;;  %v162_v27 = vld [vmem:[#allocation14 + $0x70] sm:$0xff] }
  0x72   :  { %v453_v16 = vadd.f32 %v437_v15, %v421_v14  ;;  %v156_v18 = vld [vmem:[#allocation14 + $0x40] sm:$0xff]  ;;  %900 = vmatprep.mubr.f32.mxu0 %v212_v13  ;;  %v163_v28 = vld [vmem:[#allocation14 + $0x78] sm:$0xff]  ;;  %v181_v30 = vld [vmem:[#allocation6 + $0x8] sm:$0xff]  ;;  %p1179_p1 = por %p1178_p0, %p1177_p13 }
  0x73   :  { %v996_v20 = vpack.c.bf16 %v157_v19, %v156_v18  ;;  %v160_v24 = vld [vmem:[#allocation14 + $0x60] sm:$0xff]  ;;  %v1008_v29 = vpack.c.bf16 %v163_v28, %v162_v27  ;;  %v197_v31 = vld [vmem:[#allocation9 + $0x8] sm:$0xff]  ;;  %v182_v34 = vld [vmem:[#allocation6 + $0x10] sm:$0xff] }
  0x74   :  { %987 = vmatpush3.bf16.msra.mxu0 %v984_v5  ;;  %1019 = vmatpush3.bf16.msra.mxu1 %v984_v5  ;;  %v1004_v26 = vpack.c.bf16 %v161_v25, %v160_v24  ;;  %v422_v32 = vld [vmem:[#allocation11 + $0x8] sm:$0xff]  ;;  %v198_v35 = vld [vmem:[#allocation9 + $0x10] sm:$0xff]  ;;  %v213_v38 = vadd.f32 %v197_v31, %v181_v30  ;;  %v183_v40 = vld [vmem:[#allocation6 + $0x18] sm:$0xff]  ;;  %p1180_p2 = pnand %p1179_p1, %p1173_p12 }
  0x75   :  { %989 = vmatprep.subr.bf16.mxu0 %v988_v8  ;;  %1021 = vmatprep.subr.bf16.mxu1 %v988_v8  ;;  %v438_v33 = vld [vmem:[#allocation12 + $0x8] sm:$0xff]  ;;  %v423_v36 = vld [vmem:[#allocation11 + $0x10] sm:$0xff]  ;;  %v199_v41 = vld [vmem:[#allocation9 + $0x18] sm:$0xff]  ;;  %v214_v42 = vadd.f32 %v198_v35, %v182_v34 }
  0x76   :  { %956 = vmatprep.mubr.f32.mxu1 %v453_v16  ;;  %v439_v37 = vld [vmem:[#allocation12 + $0x10] sm:$0xff]  ;;  %v454_v39 = vadd.f32 %v438_v33, %v422_v32  ;;  %v424_v44 = vld [vmem:[#allocation11 + $0x18] sm:$0xff]  ;;  %v184_v46 = vld [vmem:[#allocation6 + $0x20] sm:$0xff]  ;;  %v215_v50 = vadd.f32 %v199_v41, %v183_v40 }
  0x77   :  { %v455_v43 = vadd.f32 %v439_v37, %v423_v36  ;;  %v440_v45 = vld [vmem:[#allocation12 + $0x18] sm:$0xff]  ;;  %v200_v47 = vld [vmem:[#allocation9 + $0x20] sm:$0xff]  ;;  %v185_v52 = vld [vmem:[#allocation6 + $0x28] sm:$0xff] }
  0x78   :  { %991 = vmatpush3.bf16.msra.mxu0 %v988_v8  ;;  %1023 = vmatpush3.bf16.msra.mxu1 %v988_v8  ;;  %v425_v48 = vld [vmem:[#allocation11 + $0x20] sm:$0xff]  ;;  %v456_v51 = vadd.f32 %v440_v45, %v424_v44  ;;  %v201_v53 = vld [vmem:[#allocation9 + $0x28] sm:$0xff]  ;;  %v216_v54 = vadd.f32 %v200_v47, %v184_v46  ;;  %v186_v58 = vld [vmem:[#allocation6 + $0x30] sm:$0xff] }
  0x79   :  { %993 = vmatprep.subr.bf16.mxu0 %v992_v17  ;;  %1025 = vmatprep.subr.bf16.mxu1 %v992_v17  ;;  %v441_v49 = vld [vmem:[#allocation12 + $0x20] sm:$0xff]  ;;  %v426_v56 = vld [vmem:[#allocation11 + $0x28] sm:$0xff]  ;;  %v202_v59 = vld [vmem:[#allocation9 + $0x30] sm:$0xff]  ;;  %v217_v62 = vadd.f32 %v201_v53, %v185_v52 }
  0x7a   :  { %v457_v55 = vadd.f32 %v441_v49, %v425_v48  ;;  %v442_v57 = vld [vmem:[#allocation12 + $0x28] sm:$0xff]  ;;  %v427_v60 = vld [vmem:[#allocation11 + $0x30] sm:$0xff]  ;;  %v187_v0 = vld [vmem:[#allocation6 + $0x38] sm:$0xff]  ;;  %v218_v2 = vadd.f32 %v202_v59, %v186_v58  ;;  %v1347_v59 = vstv %s651_s21 }
  0x7b   :  { %v443_v61 = vld [vmem:[#allocation12 + $0x30] sm:$0xff]  ;;  %v458_v63 = vadd.f32 %v442_v57, %v426_v56  ;;  %v203_v1 = vld [vmem:[#allocation9 + $0x38] sm:$0xff]  ;;  %v188_v6 = vld [vmem:[#allocation6 + $0x40] sm:$0xff]  ;;  %v1345_v57 = vstv %s650_s20 }
  0x7c   :  { %995 = vmatpush3.bf16.msra.mxu0 %v992_v17  ;;  %1027 = vmatpush3.bf16.msra.mxu1 %v992_v17  ;;  %v459_v3 = vadd.f32 %v443_v61, %v427_v60  ;;  %v428_v4 = vld [vmem:[#allocation11 + $0x38] sm:$0xff]  ;;  %v204_v7 = vld [vmem:[#allocation9 + $0x40] sm:$0xff]  ;;  %v219_v10 = vadd.f32 %v203_v1, %v187_v0  ;;  %v189_v12 = vld [vmem:[#allocation6 + $0x48] sm:$0xff] }
  0x7d   :  { %997 = vmatprep.subr.bf16.mxu0 %v996_v20  ;;  %1029 = vmatprep.subr.bf16.mxu1 %v996_v20  ;;  %v444_v5 = vld [vmem:[#allocation12 + $0x38] sm:$0xff]  ;;  %v429_v8 = vld [vmem:[#allocation11 + $0x40] sm:$0xff]  ;;  %v205_v13 = vld [vmem:[#allocation9 + $0x48] sm:$0xff]  ;;  %v220_v14 = vadd.f32 %v204_v7, %v188_v6 }
  0x7e   :  { %v445_v9 = vld [vmem:[#allocation12 + $0x40] sm:$0xff]  ;;  %v460_v11 = vadd.f32 %v444_v5, %v428_v4  ;;  %v430_v16 = vld [vmem:[#allocation11 + $0x48] sm:$0xff]  ;;  %v190_v18 = vld [vmem:[#allocation6 + $0x50] sm:$0xff]  ;;  %v221_v22 = vadd.f32 %v205_v13, %v189_v12 }
  0x7f   :  { %v461_v15 = vadd.f32 %v445_v9, %v429_v8  ;;  %v446_v17 = vld [vmem:[#allocation12 + $0x48] sm:$0xff]  ;;  %v206_v19 = vld [vmem:[#allocation9 + $0x50] sm:$0xff]  ;;  %v191_v24 = vld [vmem:[#allocation6 + $0x58] sm:$0xff] }
  0x80   :  { %999 = vmatpush3.bf16.msra.mxu0 %v996_v20  ;;  %1031 = vmatpush3.bf16.msra.mxu1 %v996_v20  ;;  %v431_v20 = vld [vmem:[#allocation11 + $0x50] sm:$0xff]  ;;  %v207_v25 = vld [vmem:[#allocation9 + $0x58] sm:$0xff]  ;;  %v192_v30 = vld [vmem:[#allocation6 + $0x60] sm:$0xff] }
  0x81   :  { %1001 = vmatprep.subr.bf16.mxu0 %v1000_v23  ;;  %1033 = vmatprep.subr.bf16.mxu1 %v1000_v23  ;;  %v447_v21 = vld [vmem:[#allocation12 + $0x50] sm:$0xff]  ;;  %v432_v28 = vld [vmem:[#allocation11 + $0x58] sm:$0xff]  ;;  %v208_v31 = vld [vmem:[#allocation9 + $0x60] sm:$0xff]  ;;  %v223_v34 = vadd.f32 %v207_v25, %v191_v24 }
  0x82   :  { %v463_v27 = vadd.f32 %v447_v21, %v431_v20  ;;  %v433_v32 = vld [vmem:[#allocation11 + $0x60] sm:$0xff]  ;;  %v193_v36 = vld [vmem:[#allocation6 + $0x68] sm:$0xff]  ;;  %v435_v44 = vld [vmem:[#allocation11 + $0x70] sm:$0xff] }
  0x83   :  { %v449_v33 = vld [vmem:[#allocation12 + $0x60] sm:$0xff]  ;;  %v209_v37 = vld [vmem:[#allocation9 + $0x68] sm:$0xff]  ;;  %v451_v45 = vld [vmem:[#allocation12 + $0x70] sm:$0xff] }
  0x84   :  { %1003 = vmatpush3.bf16.msra.mxu0 %v1000_v23  ;;  %1035 = vmatpush3.bf16.msra.mxu1 %v1000_v23  ;;  %v462_v23 = vadd.f32 %v446_v17, %v430_v16  ;;  %v434_v40 = vld [vmem:[#allocation11 + $0x68] sm:$0xff]  ;;  %v225_v46 = vadd.f32 %v209_v37, %v193_v36  ;;  %v195_v48 = vld [vmem:[#allocation6 + $0x78] sm:$0xff] }
  0x85   :  { %1005 = vmatprep.subr.bf16.mxu0 %v1004_v26  ;;  %1037 = vmatprep.subr.bf16.mxu1 %v1004_v26  ;;  %v450_v41 = vld [vmem:[#allocation12 + $0x68] sm:$0xff]  ;;  %v436_v52 = vld [vmem:[#allocation11 + $0x78] sm:$0xff] }
  0x86   :  { %v466_v47 = vadd.f32 %v450_v41, %v434_v40  ;;  %v452_v53 = vld [vmem:[#allocation12 + $0x78] sm:$0xff] }
  0x88   :  { %1007 = vmatpush3.bf16.msra.mxu0 %v1004_v26  ;;  %1039 = vmatpush3.bf16.msra.mxu1 %v1004_v26  ;;  %v222_v26 = vadd.f32 %v206_v19, %v190_v18 }
  0x89   :  { %1009 = vmatprep.subr.bf16.mxu0 %v1008_v29  ;;  %1041 = vmatprep.subr.bf16.mxu1 %v1008_v29 }
  0x8c   :  { %1011 = vmatpush3.bf16.msra.mxu0 %v1008_v29  ;;  %1043 = vmatpush3.bf16.msra.mxu1 %v1008_v29  ;;  %v448_v29 = vld [vmem:[#allocation12 + $0x58] sm:$0xff] }
  0x8d   :  { %v464_v35 = vadd.f32 %v448_v29, %v432_v28 }
  0x8f   :  { %901 = vmatmul.mubr.f32.vlgmr.msra.gmra.mrb[0].mxu0 %v213_v38  ;;  %957 = vmatmul.mubr.f32.vlgmr.msra.gmra.mrb[0].mxu1 %v454_v39  ;;  %v224_v38 = vadd.f32 %v208_v31, %v192_v30  ;;  %v465_v39 = vadd.f32 %v449_v33, %v433_v32 }
  0x90   :  { %903 = vmatprep.mubr.f32.mxu0 %v214_v42  ;;  %959 = vmatprep.mubr.f32.mxu1 %v455_v43  ;;  %v194_v42 = vld [vmem:[#allocation6 + $0x70] sm:$0xff] }
  0x91   :  { %v210_v43 = vld [vmem:[#allocation9 + $0x70] sm:$0xff] }
  0x92   :  { %v226_v49 = vadd.f32 %v210_v43, %v194_v42 }
  0x93   :  { %904 = vmatmul.mubr.f32.gmra.mrb[2].mxu0 %v215_v50  ;;  %960 = vmatmul.mubr.f32.gmra.mrb[2].mxu1 %v456_v51  ;;  %v467_v50 = vadd.f32 %v451_v45, %v435_v44  ;;  %v211_v51 = vld [vmem:[#allocation9 + $0x78] sm:$0xff] }
  0x94   :  { %906 = vmatprep.mubr.f32.mxu0 %v216_v54  ;;  %962 = vmatprep.mubr.f32.mxu1 %v457_v55  ;;  %v227_v54 = vadd.f32 %v211_v51, %v195_v48  ;;  %v468_v55 = vadd.f32 %v452_v53, %v436_v52 }
  0x97   :  { %907 = vmatmul.mubr.f32.gmra.mrb[4].mxu0 %v217_v62  ;;  %963 = vmatmul.mubr.f32.gmra.mrb[4].mxu1 %v458_v63 }
  0x98   :  { %909 = vmatprep.mubr.f32.mxu0 %v218_v2  ;;  %965 = vmatprep.mubr.f32.mxu1 %v459_v3 }
  0x9b   :  { %910 = vmatmul.mubr.f32.gmra.mrb[6].mxu0 %v219_v10  ;;  %966 = vmatmul.mubr.f32.gmra.mrb[6].mxu1 %v460_v11 }
  0x9c   :  { %912 = vmatprep.mubr.f32.mxu0 %v220_v14  ;;  %968 = vmatprep.mubr.f32.mxu1 %v461_v15 }
  0x9f   :  { %913 = vmatmul.mubr.f32.gmra.mrb[8].mxu0 %v221_v22  ;;  %969 = vmatmul.mubr.f32.gmra.mrb[8].mxu1 %v462_v23 }
  0xa0   :  { %915 = vmatprep.mubr.f32.mxu0 %v222_v26  ;;  %971 = vmatprep.mubr.f32.mxu1 %v463_v27 }
  0xa3   :  { %916 = vmatmul.mubr.f32.gmra.mrb[10].mxu0 %v223_v34  ;;  %972 = vmatmul.mubr.f32.gmra.mrb[10].mxu1 %v464_v35 }
  0xa4   :  { %918 = vmatprep.mubr.f32.mxu0 %v224_v38  ;;  %974 = vmatprep.mubr.f32.mxu1 %v465_v39 }
  0xa7   :  { %919 = vmatmul.mubr.f32.gmra.mrb[12].mxu0 %v225_v46  ;;  %975 = vmatmul.mubr.f32.gmra.mrb[12].mxu1 %v466_v47 }
  0xa8   :  { %921 = vmatprep.mubr.f32.mxu0 %v226_v49  ;;  %977 = vmatprep.mubr.f32.mxu1 %v467_v50 }
  0xab   :  { %922 = vmatmul.mubr.f32.gmra.mrb[14].mxu0 %v227_v54  ;;  %978 = vmatmul.mubr.f32.gmra.mrb[14].mxu1 %v468_v55 }
 0x162   :  { %v902_v56 = vpop.f32.mrb[0].mxu0  ;;  %v958_v58 = vpop.f32.mrb[0].mxu1 }
 0x163   :  { %v669_v60 = vmax.f32 %v902_v56, 0.0  ;;  %v701_v61 = vmax.f32 %v958_v58, 0.0  ;;  %v294_v62 = vpop.f32.mrb[1].mxu0  ;;  %v535_v63 = vpop.f32.mrb[1].mxu1 }
 0x164   :  { %v668_v0 = vmax.f32 %v294_v62, 0.0  ;;  %v700_v1 = vmax.f32 %v535_v63, 0.0 }
 0x165   :  { %v718_v2 = vmul.f32 %v1345_v57, %v669_v60  ;;  %v735_v3 = vmul.f32 %v1347_v59, %v701_v61 }
 0x166   :  { %v717_v4 = vmul.f32 %v1345_v57, %v668_v0  ;;  %v734_v5 = vmul.f32 %v1347_v59, %v700_v1  ;;  %v905_v6 = vpop.f32.mrb[2].mxu0  ;;  %v961_v7 = vpop.f32.mrb[2].mxu1 }
 0x167   :  { %v751_v8 = vadd.f32 %v735_v3, %v718_v2  ;;  %v671_v9 = vmax.f32 %v905_v6, 0.0  ;;  %v703_v10 = vmax.f32 %v961_v7, 0.0  ;;  %v304_v11 = vpop.f32.mrb[3].mxu0  ;;  %v545_v12 = vpop.f32.mrb[3].mxu1 }
 0x168   :  { %v750_v13 = vadd.f32 %v734_v5, %v717_v4  ;;  %v670_v14 = vmax.f32 %v304_v11, 0.0  ;;  %v702_v15 = vmax.f32 %v545_v12, 0.0 }
 0x169   :  { %767 = vst [vmem:[#allocation15 + $0x8] sm:$0xff] %v751_v8  ;;  %v720_v16 = vmul.f32 %v1345_v57, %v671_v9  ;;  %v737_v17 = vmul.f32 %v1347_v59, %v703_v10 }
 0x16a   :  { %766 = vst [vmem:[#allocation15] sm:$0xff] %v750_v13  ;;  %v719_v18 = vmul.f32 %v1345_v57, %v670_v14  ;;  %v736_v19 = vmul.f32 %v1347_v59, %v702_v15  ;;  %v908_v20 = vpop.f32.mrb[4].mxu0  ;;  %v964_v21 = vpop.f32.mrb[4].mxu1 }
 0x16b   :  { %v753_v22 = vadd.f32 %v737_v17, %v720_v16  ;;  %v673_v23 = vmax.f32 %v908_v20, 0.0  ;;  %v705_v24 = vmax.f32 %v964_v21, 0.0  ;;  %v314_v25 = vpop.f32.mrb[5].mxu0  ;;  %v555_v26 = vpop.f32.mrb[5].mxu1 }
 0x16c   :  { %v752_v27 = vadd.f32 %v736_v19, %v719_v18  ;;  %v672_v28 = vmax.f32 %v314_v25, 0.0  ;;  %v704_v29 = vmax.f32 %v555_v26, 0.0 }
 0x16d   :  { %769 = vst [vmem:[#allocation15 + $0x18] sm:$0xff] %v753_v22  ;;  %v722_v30 = vmul.f32 %v1345_v57, %v673_v23  ;;  %v739_v31 = vmul.f32 %v1347_v59, %v705_v24 }
 0x16e   :  { %768 = vst [vmem:[#allocation15 + $0x10] sm:$0xff] %v752_v27  ;;  %v721_v32 = vmul.f32 %v1345_v57, %v672_v28  ;;  %v738_v33 = vmul.f32 %v1347_v59, %v704_v29  ;;  %v911_v34 = vpop.f32.mrb[6].mxu0  ;;  %v967_v35 = vpop.f32.mrb[6].mxu1 }
 0x16f   :  { %v755_v36 = vadd.f32 %v739_v31, %v722_v30  ;;  %v675_v37 = vmax.f32 %v911_v34, 0.0  ;;  %v707_v38 = vmax.f32 %v967_v35, 0.0  ;;  %v324_v39 = vpop.f32.mrb[7].mxu0  ;;  %v565_v40 = vpop.f32.mrb[7].mxu1 }
 0x170   :  { %v754_v41 = vadd.f32 %v738_v33, %v721_v32  ;;  %v674_v42 = vmax.f32 %v324_v39, 0.0  ;;  %v706_v43 = vmax.f32 %v565_v40, 0.0 }
 0x171   :  { %771 = vst [vmem:[#allocation15 + $0x28] sm:$0xff] %v755_v36  ;;  %v724_v44 = vmul.f32 %v1345_v57, %v675_v37  ;;  %v741_v45 = vmul.f32 %v1347_v59, %v707_v38 }
 0x172   :  { %770 = vst [vmem:[#allocation15 + $0x20] sm:$0xff] %v754_v41  ;;  %v723_v46 = vmul.f32 %v1345_v57, %v674_v42  ;;  %v740_v47 = vmul.f32 %v1347_v59, %v706_v43  ;;  %v914_v48 = vpop.f32.mrb[8].mxu0  ;;  %v970_v49 = vpop.f32.mrb[8].mxu1 }
 0x173   :  { %v757_v50 = vadd.f32 %v741_v45, %v724_v44  ;;  %v677_v51 = vmax.f32 %v914_v48, 0.0  ;;  %v709_v52 = vmax.f32 %v970_v49, 0.0  ;;  %v334_v53 = vpop.f32.mrb[9].mxu0  ;;  %v575_v54 = vpop.f32.mrb[9].mxu1 }
 0x174   :  { %v756_v55 = vadd.f32 %v740_v47, %v723_v46  ;;  %v676_v56 = vmax.f32 %v334_v53, 0.0  ;;  %v708_v58 = vmax.f32 %v575_v54, 0.0 }
 0x175   :  { %773 = vst [vmem:[#allocation15 + $0x38] sm:$0xff] %v757_v50  ;;  %v726_v60 = vmul.f32 %v1345_v57, %v677_v51  ;;  %v743_v61 = vmul.f32 %v1347_v59, %v709_v52 }
 0x176   :  { %772 = vst [vmem:[#allocation15 + $0x30] sm:$0xff] %v756_v55  ;;  %v725_v62 = vmul.f32 %v1345_v57, %v676_v56  ;;  %v742_v63 = vmul.f32 %v1347_v59, %v708_v58  ;;  %v917_v0 = vpop.f32.mrb[10].mxu0  ;;  %v973_v1 = vpop.f32.mrb[10].mxu1 }
 0x177   :  { %v759_v2 = vadd.f32 %v743_v61, %v726_v60  ;;  %v679_v3 = vmax.f32 %v917_v0, 0.0  ;;  %v711_v4 = vmax.f32 %v973_v1, 0.0  ;;  %v344_v5 = vpop.f32.mrb[11].mxu0  ;;  %v585_v6 = vpop.f32.mrb[11].mxu1 }
 0x178   :  { %v758_v7 = vadd.f32 %v742_v63, %v725_v62  ;;  %v678_v8 = vmax.f32 %v344_v5, 0.0  ;;  %v710_v9 = vmax.f32 %v585_v6, 0.0 }
 0x179   :  { %775 = vst [vmem:[#allocation15 + $0x48] sm:$0xff] %v759_v2  ;;  %v728_v10 = vmul.f32 %v1345_v57, %v679_v3  ;;  %v745_v11 = vmul.f32 %v1347_v59, %v711_v4 }
 0x17a   :  { %774 = vst [vmem:[#allocation15 + $0x40] sm:$0xff] %v758_v7  ;;  %v727_v12 = vmul.f32 %v1345_v57, %v678_v8  ;;  %v744_v13 = vmul.f32 %v1347_v59, %v710_v9  ;;  %v920_v14 = vpop.f32.mrb[12].mxu0  ;;  %v976_v15 = vpop.f32.mrb[12].mxu1 }
 0x17b   :  { %v761_v16 = vadd.f32 %v745_v11, %v728_v10  ;;  %v681_v17 = vmax.f32 %v920_v14, 0.0  ;;  %v713_v18 = vmax.f32 %v976_v15, 0.0  ;;  %v354_v19 = vpop.f32.mrb[13].mxu0  ;;  %v595_v20 = vpop.f32.mrb[13].mxu1 }
 0x17c   :  { %v760_v21 = vadd.f32 %v744_v13, %v727_v12  ;;  %v680_v22 = vmax.f32 %v354_v19, 0.0  ;;  %v712_v23 = vmax.f32 %v595_v20, 0.0 }
 0x17d   :  { %777 = vst [vmem:[#allocation15 + $0x58] sm:$0xff] %v761_v16  ;;  %v730_v24 = vmul.f32 %v1345_v57, %v681_v17  ;;  %v747_v25 = vmul.f32 %v1347_v59, %v713_v18 }
 0x17e   :  { %776 = vst [vmem:[#allocation15 + $0x50] sm:$0xff] %v760_v21  ;;  %v729_v26 = vmul.f32 %v1345_v57, %v680_v22  ;;  %v746_v27 = vmul.f32 %v1347_v59, %v712_v23  ;;  %v923_v28 = vpop.f32.mrb[14].mxu0  ;;  %v979_v29 = vpop.f32.mrb[14].mxu1 }
 0x17f   :  { %v763_v30 = vadd.f32 %v747_v25, %v730_v24  ;;  %v683_v31 = vmax.f32 %v923_v28, 0.0  ;;  %v715_v32 = vmax.f32 %v979_v29, 0.0  ;;  %v364_v33 = vpop.f32.mrb[15].mxu0  ;;  %v605_v34 = vpop.f32.mrb[15].mxu1 }
 0x180   :  { %v762_v35 = vadd.f32 %v746_v27, %v729_v26  ;;  %v682_v36 = vmax.f32 %v364_v33, 0.0  ;;  %v714_v37 = vmax.f32 %v605_v34, 0.0 }
 0x181   :  { %779 = vst [vmem:[#allocation15 + $0x68] sm:$0xff] %v763_v30  ;;  %v732_v38 = vmul.f32 %v1345_v57, %v683_v31  ;;  %v749_v39 = vmul.f32 %v1347_v59, %v715_v32 }
 0x182   :  { %778 = vst [vmem:[#allocation15 + $0x60] sm:$0xff] %v762_v35  ;;  %v731_v40 = vmul.f32 %v1345_v57, %v682_v36  ;;  %v748_v41 = vmul.f32 %v1347_v59, %v714_v37 }
 0x183   :  { %v765_v42 = vadd.f32 %v749_v39, %v732_v38 }
 0x184   :  { %v764_v43 = vadd.f32 %v748_v41, %v731_v40 }
 0x185   :  { %781 = vst [vmem:[#allocation15 + $0x78] sm:$0xff] %v765_v42 }
 0x186   :  { %780 = vst [vmem:[#allocation15 + $0x70] sm:$0xff] %v764_v43 }
 0x187   :  { %1183 = shalt.err (!%p1180_p2)
}
 0x188   :  { %s1184_s23 = scalar_lea.hbm %s1402_s6, 2048 }
 0x189   :  { %p1185_p3 = scmp.ne.s32.totalorder %s1402_s6, %s1184_s23  ;;  %p1188_p4 = scmp.lt.u32.totalorder %s1184_s23, %s1402_s6 }
 0x18b   :  { %p1190_p5 = pnand %p1188_p4, %p1185_p3 }
 0x18d   :  { %1193 = shalt.err (!%p1190_p5)
}
 0x18e   :  { %793 = dma.vmem_to_hbm [thread:$0]  %s788_s22, 2048, %s1402_s6, [#allocation8], %s1205_s17, %s1205_s17, %s1206_s2  }
 0x18f   :  { %1200 = dma.done.wait [#allocation8], 2048  }
 0x190   :  { %1201 = vsyncadd [#allocation8], 4294965248 }
 0x191   :  { %797 = vsyncpa [#allocation7], 1 }
 0x192   :  { %798 = vsyncpa [#allocation10], 1 }
 0x193   :  { %799 = vsyncpa [#allocation13], 1 }
 0x194   :  { %800 = vsyncpa [#allocation8], 1 }

</bundles_post_ra>
